<compile_context>
chip_gen: v6e
topology: v6e:2x2x1
jax: 0.10.0
libtpu: 0.0.40
codegen_flags: <defaults>
</compile_context>

<pallas_src>
import functools
import math

import jax
import jax.numpy as jnp
from jax import lax
from jax.experimental import pallas as pl
from jax.experimental.pallas import tpu as pltpu


def _round_up(x, m):
    return ((x + m - 1) // m) * m


# ----------------------- DFT operator construction (trace-time) -----------------------

def _kron_dft_operator(h, w, dtype):
    """(H*W, 2*P) real operator: x_flat @ K = [Re(rfft2) | Im(rfft2)], lane-padded."""
    wf = w // 2 + 1
    p = _round_up(h * wf, 128)
    hh = jnp.arange(h, dtype=jnp.int32)
    ww = jnp.arange(w, dtype=jnp.int32)
    kh = jnp.arange(h, dtype=jnp.int32)
    kw = jnp.arange(wf, dtype=jnp.int32)
    fh = ((hh[:, None] * kh[None, :]) % h).astype(jnp.float32) / h      # (H, H)
    fw = ((ww[:, None] * kw[None, :]) % w).astype(jnp.float32) / w      # (W, Wf)
    theta = (2.0 * math.pi) * (fh[:, None, :, None] + fw[None, :, None, :])  # (H,W,H,Wf)
    kr = jnp.cos(theta).reshape(h * w, h * wf)
    ki = (-jnp.sin(theta)).reshape(h * w, h * wf)
    pad = ((0, 0), (0, p - h * wf))
    k = jnp.concatenate([jnp.pad(kr, pad), jnp.pad(ki, pad)], axis=1)   # (H*W, 2P)
    return k.astype(dtype), p


def _twostage_dft_operators(h, w, dtype):
    """Fused W-stage [cos | -sin] (W, 2*Nf) and H-stage cos/sin (H, H) operators."""
    wf = w // 2 + 1
    nf = _round_up(wf, 128)
    ww = jnp.arange(w, dtype=jnp.int32)
    kw = jnp.arange(wf, dtype=jnp.int32)
    tw = (2.0 * math.pi) * ((ww[:, None] * kw[None, :]) % w).astype(jnp.float32) / w
    pad = ((0, 0), (0, nf - wf))
    fw = jnp.concatenate([jnp.pad(jnp.cos(tw), pad), jnp.pad(-jnp.sin(tw), pad)], axis=1)
    hh = jnp.arange(h, dtype=jnp.int32)
    th = (2.0 * math.pi) * ((hh[:, None] * hh[None, :]) % h).astype(jnp.float32) / h
    return fw.astype(dtype), jnp.cos(th).astype(dtype), jnp.sin(th).astype(dtype), nf


# ----------------------------------- kernels ------------------------------------------

def _make_kron_kernel(p, compute_dtype):
    """Small-plane path: rfft2 of a (tn, H*W) tile as one matmul per input."""

    def kernel(yh_ref, y_ref, k_ref, out_ref):
        k = k_ref[...]                                                   # (HW, 2P) bf16
        zh = jnp.dot(yh_ref[...].astype(compute_dtype), k,
                     preferred_element_type=jnp.float32)                 # (tn, 2P) f32
        zy = jnp.dot(y_ref[...].astype(compute_dtype), k,
                     preferred_element_type=jnp.float32)
        amp_h = jnp.sqrt(zh[:, :p] * zh[:, :p] + zh[:, p:] * zh[:, p:])
        amp_y = jnp.sqrt(zy[:, :p] * zy[:, :p] + zy[:, p:] * zy[:, p:])
        diff = jnp.abs(amp_h - amp_y)                                    # (tn, P)
        # Per-lane partial sums (sublane reduce only); padded columns are 0 for both.
        out_ref[...] = jnp.sum(diff, axis=0, keepdims=True).reshape(1, 1, p)

    return kernel


def _make_twostage_kernel(tn, h, w, nf, compute_dtype):
    """Large-plane path: batched W-stage matmul + per-plane H-stage from VMEM scratch."""

    def kernel(yh_ref, y_ref, fw_ref, ch_ref, sh_ref, out_ref, ybh_ref, yby_ref):
        fw = fw_ref[...]                                                 # (W, 2Nf)
        ch = ch_ref[...]                                                 # (H, H)
        sh = sh_ref[...]                                                 # (H, H)
        m = tn * h
        xh = yh_ref[...].reshape(m, w).astype(compute_dtype)             # leading-dim collapse: free
        xy = y_ref[...].reshape(m, w).astype(compute_dtype)
        # Batched rfft along W for every plane of the tile (one matmul per input).
        ybh_ref[...] = jnp.dot(xh, fw, preferred_element_type=jnp.float32).astype(compute_dtype)
        yby_ref[...] = jnp.dot(xy, fw, preferred_element_type=jnp.float32).astype(compute_dtype)

        def amp(yp):                                                     # yp: (H, 2Nf)
            yr = yp[:, :nf]
            yi = yp[:, nf:]
            zr = (jnp.dot(ch, yr, preferred_element_type=jnp.float32)
                  + jnp.dot(sh, yi, preferred_element_type=jnp.float32))
            zi = (jnp.dot(ch, yi, preferred_element_type=jnp.float32)
                  - jnp.dot(sh, yr, preferred_element_type=jnp.float32))
            return jnp.sqrt(zr * zr + zi * zi)                           # (H, Nf)

        def body(pi, acc):
            off = pl.multiple_of(pi * h, h)
            d = jnp.abs(amp(ybh_ref[pl.ds(off, h), :]) - amp(yby_ref[pl.ds(off, h), :]))
            return acc + jnp.sum(d, axis=0, keepdims=True)               # (1, Nf)

        acc = lax.fori_loop(0, tn, body, jnp.zeros((1, nf), jnp.float32))
        out_ref[...] = acc.reshape(1, 1, nf)

    return kernel


# ----------------------------------- wrapper ------------------------------------------

def _plan_tiles(n_planes, plane_bytes, planes_per_step, sublane_multiple):
    """Planes per grid step (tn) and grid size g, keeping g >= 2 for pipelining/megacore."""
    target_bytes = 2 << 20        # ~2 MiB per input per step: v7x (64 MiB VMEM) safe.
    if planes_per_step is None:
        tn = max(1, target_bytes // max(plane_bytes, 1))
    else:
        tn = max(1, int(planes_per_step))
    if n_planes >= 2:
        tn = min(tn, (n_planes + 1) // 2)
    else:
        tn = 1
    if sublane_multiple > 1 and tn % sublane_multiple != 0 and tn != n_planes:
        tn = _round_up(tn, sublane_multiple)   # (8,128) block constraint on 2-D tiles
    g = pl.cdiv(n_planes, tn)
    if n_planes >= 2:
        g = max(g, 2)
    return tn, g


@functools.partial(jax.jit, static_argnames=("planes_per_step", "compute_dtype"))
def four_domain_loss3(y_hat, y, planes_per_step=None, compute_dtype=jnp.bfloat16):
    """loss = mean(| |rfft2(y_hat)| - |rfft2(y)| |), rfft2 over the last two dims."""
    assert y_hat.shape == y.shape, "y_hat and y must have the same shape"
    shape = y_hat.shape
    assert len(shape) >= 2
    h, w = int(shape[-2]), int(shape[-1])
    wf = w // 2 + 1
    n_planes = 1
    for d in shape[:-2]:
        n_planes *= int(d)

    itemsize = jnp.dtype(y_hat.dtype).itemsize
    plane_bytes = h * w * itemsize
    cd_bytes = jnp.dtype(compute_dtype).itemsize
    use_kron = (h * w) <= 1024

    if use_kron:
        # ---- Kronecker 2-D DFT: one matmul per input per grid step ----
        k_op, p = _kron_dft_operator(h, w, compute_dtype)
        tn, g = _plan_tiles(n_planes, plane_bytes, planes_per_step, sublane_multiple=8)
        n_pad = g * tn
        yh2 = y_hat.reshape(n_planes, h * w)          # free contiguous reshape, no cast
        yy2 = y.reshape(n_planes, h * w)
        if n_pad != n_planes:                         # zero planes -> zero amps -> add 0
            yh2 = jnp.pad(yh2, ((0, n_pad - n_planes), (0, 0)))
            yy2 = jnp.pad(yy2, ((0, n_pad - n_planes), (0, 0)))

        in_tile = tn * h * w * itemsize
        est = (4 * in_tile + 2 * h * w * 2 * p * cd_bytes
               + tn * (4 * h * w + 28 * p) + (1 << 20))
        partials = pl.pallas_call(
            _make_kron_kernel(p, compute_dtype),
            out_shape=jax.ShapeDtypeStruct((g, 1, p), jnp.float32),
            grid=(g,),
            in_specs=[
                pl.BlockSpec((tn, h * w), lambda i: (i, 0)),     # y_hat planes (flat)
                pl.BlockSpec((tn, h * w), lambda i: (i, 0)),     # y planes (flat)
                pl.BlockSpec((h * w, 2 * p), lambda i: (0, 0)),  # Kronecker DFT operator
            ],
            out_specs=pl.BlockSpec((1, 1, p), lambda i: (i, 0, 0)),
            compiler_params=pltpu.CompilerParams(
                dimension_semantics=("parallel",),
                vmem_limit_bytes=int(min(48 << 20, max(32 << 20, 2 * est)))),
        )(yh2, yy2, k_op)
    else:
        # ---- two-stage DFT: batched W-stage matmul, per-plane H-stage ----
        fw_op, ch_op, sh_op, nf = _twostage_dft_operators(h, w, compute_dtype)
        tn, g = _plan_tiles(n_planes, plane_bytes, planes_per_step, sublane_multiple=1)
        n_pad = g * tn
        yh3 = y_hat.reshape(n_planes, h, w)
        yy3 = y.reshape(n_planes, h, w)
        if n_pad != n_planes:
            yh3 = jnp.pad(yh3, ((0, n_pad - n_planes), (0, 0), (0, 0)))
            yy3 = jnp.pad(yy3, ((0, n_pad - n_planes), (0, 0), (0, 0)))

        in_tile = tn * h * w * itemsize
        const_b = (w * 2 * nf + 2 * h * h) * cd_bytes
        scratch_b = 2 * tn * h * 2 * nf * cd_bytes
        est = 4 * in_tile + 2 * const_b + scratch_b + 16 * h * nf * 4 + (1 << 20)
        partials = pl.pallas_call(
            _make_twostage_kernel(tn, h, w, nf, compute_dtype),
            out_shape=jax.ShapeDtypeStruct((g, 1, nf), jnp.float32),
            grid=(g,),
            in_specs=[
                pl.BlockSpec((tn, h, w), lambda i: (i, 0, 0)),   # y_hat planes
                pl.BlockSpec((tn, h, w), lambda i: (i, 0, 0)),   # y planes
                pl.BlockSpec((w, 2 * nf), lambda i: (0, 0)),     # fused [cos|-sin] W-DFT
                pl.BlockSpec((h, h), lambda i: (0, 0)),          # cos H-DFT
                pl.BlockSpec((h, h), lambda i: (0, 0)),          # sin H-DFT
            ],
            out_specs=pl.BlockSpec((1, 1, nf), lambda i: (i, 0, 0)),
            scratch_shapes=[
                pltpu.VMEM((tn * h, 2 * nf), compute_dtype),     # W-stage output, y_hat
                pltpu.VMEM((tn * h, 2 * nf), compute_dtype),     # W-stage output, y
            ],
            compiler_params=pltpu.CompilerParams(
                dimension_semantics=("parallel",),
                vmem_limit_bytes=int(min(48 << 20, max(32 << 20, 2 * est)))),
        )(yh3, yy3, fw_op, ch_op, sh_op)

    total = jnp.sum(partials)                 # padded planes/columns contribute exactly 0
    count = n_planes * h * wf                 # true (unpadded) element count of |rfft2|
    return (total / jnp.float32(count)).astype(jnp.float32)


if __name__ == "__main__":
    key = jax.random.PRNGKey(0)
    k1, k2, k3, k4 = jax.random.split(key, 4)

    # Small-plane (Kronecker DFT) path: NCHW = 2, 4, 16, 16.
    B, C, H, W = 2, 4, 16, 16
    y_hat = jax.random.uniform(k1, (B, C, H, W), dtype=jnp.float32)
    y = jax.random.uniform(k2, (B, C, H, W), dtype=jnp.float32)
    loss = four_domain_loss3(y_hat, y)
    jax.block_until_ready(loss)
    ref = jnp.mean(jnp.abs(jnp.abs(jnp.fft.rfft2(y_hat)) - jnp.abs(jnp.fft.rfft2(y))))
    assert bool(jnp.isfinite(loss)), loss
    assert abs(float(loss) - float(ref)) <= 0.05 * abs(float(ref)) + 1e-3, (float(loss), float(ref))

    # Larger-plane (batched two-stage DFT) path; also exercises zero-plane padding.
    B2, C2, H2, W2 = 1, 3, 32, 40
    y_hat2 = jax.random.uniform(k3, (B2, C2, H2, W2), dtype=jnp.float32)
    y2 = jax.random.uniform(k4, (B2, C2, H2, W2), dtype=jnp.float32)
    loss2 = four_domain_loss3(y_hat2, y2)
    jax.block_until_ready(loss2)
    ref2 = jnp.mean(jnp.abs(jnp.abs(jnp.fft.rfft2(y_hat2)) - jnp.abs(jnp.fft.rfft2(y2))))
    assert bool(jnp.isfinite(loss2)), loss2
    assert abs(float(loss2) - float(ref2)) <= 0.05 * abs(float(ref2)) + 1e-3, (float(loss2), float(ref2))

    print("KERNEL_OK")
</pallas_src>

<mosaic_0001>
module attributes {stable_mosaic.version = 11 : i64} {
  func.func @kernel(%arg0: i32, %arg1: memref<8x256xf32, #tpu.memory_space<vmem>>, %arg2: memref<8x256xf32, #tpu.memory_space<vmem>>, %arg3: memref<256x512xbf16, #tpu.memory_space<vmem>>, %arg4: memref<1x1x256xf32, #tpu.memory_space<vmem>>) attributes {dimension_semantics = [#tpu.dimension_semantics<parallel>], iteration_bounds = array<i64: 2>, scalar_prefetch = 0 : i64, scratch_operands = 0 : i64, tpu.core_type = #tpu.core_type<tc>, window_params = [{transform_indices = @transform_0, window_bounds = array<i64: 8, 256>}, {transform_indices = @transform_1, window_bounds = array<i64: 8, 256>}, {pipeline_mode = #tpu.pipeline_mode<synchronous>, transform_indices = @transform_2, window_bounds = array<i64: 256, 512>}, {transform_indices = @transform_3, window_bounds = array<i64: 1, 1, 256>}]} {
    %c0 = arith.constant 0 : index
    %c0_0 = arith.constant 0 : index
    %0 = vector.load %arg3[%c0, %c0_0] : memref<256x512xbf16, #tpu.memory_space<vmem>>, vector<256x512xbf16>
    %c0_1 = arith.constant 0 : index
    %c0_2 = arith.constant 0 : index
    %1 = vector.load %arg1[%c0_1, %c0_2] : memref<8x256xf32, #tpu.memory_space<vmem>>, vector<8x256xf32>
    %2 = arith.truncf %1 : vector<8x256xf32> to vector<8x256xbf16>
    %cst = arith.constant dense<0.000000e+00> : vector<8x512xf32>
    %3 = tpu.matmul %2, %0, %cst {dimension_numbers = #tpu.dot_dimension_numbers<[1], [0], [0], [1], [0, 0, 1, 1], [], []>} : vector<8x256xbf16>, vector<256x512xbf16>, vector<8x512xf32> -> vector<8x512xf32>
    %c0_3 = arith.constant 0 : index
    %c0_4 = arith.constant 0 : index
    %4 = vector.load %arg2[%c0_3, %c0_4] : memref<8x256xf32, #tpu.memory_space<vmem>>, vector<8x256xf32>
    %5 = arith.truncf %4 : vector<8x256xf32> to vector<8x256xbf16>
    %cst_5 = arith.constant dense<0.000000e+00> : vector<8x512xf32>
    %6 = tpu.matmul %5, %0, %cst_5 {dimension_numbers = #tpu.dot_dimension_numbers<[1], [0], [0], [1], [0, 0, 1, 1], [], []>} : vector<8x256xbf16>, vector<256x512xbf16>, vector<8x512xf32> -> vector<8x512xf32>
    %7 = vector.extract_strided_slice %3 {offsets = [0, 0], sizes = [8, 256], strides = [1, 1]} : vector<8x512xf32> to vector<8x256xf32>
    %8 = vector.extract_strided_slice %3 {offsets = [0, 0], sizes = [8, 256], strides = [1, 1]} : vector<8x512xf32> to vector<8x256xf32>
    %9 = arith.mulf %7, %8 : vector<8x256xf32>
    %10 = vector.extract_strided_slice %3 {offsets = [0, 256], sizes = [8, 256], strides = [1, 1]} : vector<8x512xf32> to vector<8x256xf32>
    %11 = vector.extract_strided_slice %3 {offsets = [0, 256], sizes = [8, 256], strides = [1, 1]} : vector<8x512xf32> to vector<8x256xf32>
    %12 = arith.mulf %10, %11 : vector<8x256xf32>
    %13 = arith.addf %9, %12 : vector<8x256xf32>
    %14 = math.sqrt %13 : vector<8x256xf32>
    %15 = vector.extract_strided_slice %6 {offsets = [0, 0], sizes = [8, 256], strides = [1, 1]} : vector<8x512xf32> to vector<8x256xf32>
    %16 = vector.extract_strided_slice %6 {offsets = [0, 0], sizes = [8, 256], strides = [1, 1]} : vector<8x512xf32> to vector<8x256xf32>
    %17 = arith.mulf %15, %16 : vector<8x256xf32>
    %18 = vector.extract_strided_slice %6 {offsets = [0, 256], sizes = [8, 256], strides = [1, 1]} : vector<8x512xf32> to vector<8x256xf32>
    %19 = vector.extract_strided_slice %6 {offsets = [0, 256], sizes = [8, 256], strides = [1, 1]} : vector<8x512xf32> to vector<8x256xf32>
    %20 = arith.mulf %18, %19 : vector<8x256xf32>
    %21 = arith.addf %17, %20 : vector<8x256xf32>
    %22 = math.sqrt %21 : vector<8x256xf32>
    %23 = arith.subf %14, %22 : vector<8x256xf32>
    %24 = math.absf %23 : vector<8x256xf32>
    %cst_6 = arith.constant dense<0.000000e+00> : vector<256xf32>
    %25 = vector.multi_reduction <add>, %24, %cst_6 [0] : vector<8x256xf32> to vector<256xf32>
    %26 = vector.shape_cast %25 : vector<256xf32> to vector<1x256xf32>
    %27 = vector.shape_cast %26 : vector<1x256xf32> to vector<1x1x256xf32>
    %c0_7 = arith.constant 0 : index
    %c0_8 = arith.constant 0 : index
    %c0_9 = arith.constant 0 : index
    %28 = vector.load %arg4[%c0_7, %c0_8, %c0_9] : memref<1x1x256xf32, #tpu.memory_space<vmem>>, vector<1x1x256xf32>
    tpu.vector_store %arg4[%c0_7, %c0_8, %c0_9], %27 {strides = array<i32>} : memref<1x1x256xf32, #tpu.memory_space<vmem>>, vector<1x1x256xf32>,
    return
  }
  func.func @transform_0(%arg0: i32) -> (i32, i32) {
    %c0_i32 = arith.constant 0 : i32
    %c0_i32_0 = arith.constant 0 : i32
    return %arg0, %c0_i32 : i32, i32
  }
  func.func @transform_1(%arg0: i32) -> (i32, i32) {
    %c0_i32 = arith.constant 0 : i32
    %c0_i32_0 = arith.constant 0 : i32
    return %arg0, %c0_i32 : i32, i32
  }
  func.func @transform_2(%arg0: i32) -> (i32, i32) {
    %c0_i32 = arith.constant 0 : i32
    %c0_i32_0 = arith.constant 0 : i32
    %c0_i32_1 = arith.constant 0 : i32
    return %c0_i32, %c0_i32_0 : i32, i32
  }
  func.func @transform_3(%arg0: i32) -> (i32, i32, i32) {
    %c0_i32 = arith.constant 0 : i32
    %c0_i32_0 = arith.constant 0 : i32
    %c0_i32_1 = arith.constant 0 : i32
    return %arg0, %c0_i32, %c0_i32_0 : i32, i32, i32
  }
}

</mosaic_0001>

<bundles_post_ra>
// kernel: four_domain_loss3.1
= control target key start
LH: loop header
LB: loop body
LE: loop exit
PB: predicated region body
PF: predicated region fallthrough
CT: control target
= control target key end

     0   :  { %s1109_s12 = smov 0   ;;  %s1597_s0 = inlined_call_operand.vmem [shape: f32[16,256], index: 0, kind: input, shape index: {}]   ;;  %s1598_s1 = inlined_call_operand.vmem [shape: f32[16,256], index: 1, kind: input, shape index: {}]   ;;  %s1599_s2 = inlined_call_operand.vmem [shape: bf16[256,512], index: 2, kind: input, shape index: {}]   ;;  %s1600_s3 = inlined_call_operand.vmem [shape: f32[2,1,256], index: 3, kind: output, shape index: {}]  }
   0x1 LB: > { %s889_s13 = sadd.s32 4294967295, %s1086_s12   ;;  %p893_p0 = scmp.ge.s32.totalorder %s1086_s12, 1  ;;  %s1086_s12 = sphi %s1109_s12, %s13_s12  }
   0x2   : > { %p147_p1 = scmp.lt.s32.totalorder %s1086_s12, 3 }
   0x4   : > { %p148_p2 = pnand %p893_p0, %p147_p1 }
   0x6   : > { %151 = sbr.rel (%p148_p2) target bundleno = 380 (0x17c), region = 32 }
   0xb   : > { %v1120_v0 = vld [vmem:[%s1599_s2 + $0xe4] ss:$16 sps:$4 sm:$0xff]   ;;  %v1125_v1 = vld [vmem:[%s1599_s2 + $0xec] ss:$16 sps:$4 sm:$0xff]   ;;  %v1131_v2 = vld [vmem:[%s1599_s2 + $0xe0] ss:$16 sps:$4 sm:$0xff]  }
   0xc   : > { %577 = vmatprep.subr.bf16.mxu0 %v1120_v0  ;;  %v1136_v3 = vld [vmem:[%s1599_s2 + $0xe8] ss:$16 sps:$4 sm:$0xff]   ;;  %618 = vmatprep.subr.bf16.mxu1 %v1125_v1  ;;  %v1142_v4 = vld [vmem:[%s1599_s2 + $0xc4] ss:$16 sps:$4 sm:$0xff]   ;;  %v1149_v5 = vld [vmem:[%s1599_s2 + $0xcc] ss:$16 sps:$4 sm:$0xff]  }
   0xd   : > { %578 = vmatpush1.bf16.msra.mxu0 %v1131_v2  ;;  %619 = vmatpush1.bf16.msra.mxu1 %v1136_v3  ;;  %v1154_v6 = vld [vmem:[%s1599_s2 + $0xc0] ss:$16 sps:$4 sm:$0xff]   ;;  %v1160_v7 = vld [vmem:[%s1599_s2 + $0xc8] ss:$16 sps:$4 sm:$0xff]   ;;  %v1166_v8 = vld [vmem:[%s1599_s2 + $0xa4] ss:$16 sps:$4 sm:$0xff]  }
   0xe   : > { %579 = vmatprep.subr.bf16.mxu0 %v1142_v4  ;;  %620 = vmatprep.subr.bf16.mxu1 %v1149_v5  ;;  %v1171_v9 = vld [vmem:[%s1599_s2 + $0xac] ss:$16 sps:$4 sm:$0xff]   ;;  %v1176_v10 = vld [vmem:[%s1599_s2 + $0xa0] ss:$16 sps:$4 sm:$0xff]   ;;  %v1181_v11 = vld [vmem:[%s1599_s2 + $0xa8] ss:$16 sps:$4 sm:$0xff]  }
   0xf   : > { %v1188_v12 = vld [vmem:[%s1599_s2 + $0x84] ss:$16 sps:$4 sm:$0xff]   ;;  %v1195_v13 = vld [vmem:[%s1599_s2 + $0x8c] ss:$16 sps:$4 sm:$0xff]   ;;  %v1200_v14 = vld [vmem:[%s1599_s2 + $0x80] ss:$16 sps:$4 sm:$0xff]  }
  0x10   : > { %v1207_v15 = vld [vmem:[%s1599_s2 + $0x88] ss:$16 sps:$4 sm:$0xff]   ;;  %v1212_v16 = vld [vmem:[%s1599_s2 + $0x64] ss:$16 sps:$4 sm:$0xff]   ;;  %v1219_v17 = vld [vmem:[%s1599_s2 + $0x6c] ss:$16 sps:$4 sm:$0xff]  }
  0x11   : > { %580 = vmatpush1.bf16.msra.mxu0 %v1154_v6  ;;  %621 = vmatpush1.bf16.msra.mxu1 %v1160_v7  ;;  %v1224_v18 = vld [vmem:[%s1599_s2 + $0x60] ss:$16 sps:$4 sm:$0xff]   ;;  %v1229_v19 = vld [vmem:[%s1599_s2 + $0x68] ss:$16 sps:$4 sm:$0xff]   ;;  %v1236_v20 = vld [vmem:[%s1599_s2 + $0x44] ss:$16 sps:$4 sm:$0xff]  }
  0x12   : > { %581 = vmatprep.subr.bf16.mxu0 %v1166_v8  ;;  %622 = vmatprep.subr.bf16.mxu1 %v1171_v9  ;;  %v1243_v21 = vld [vmem:[%s1599_s2 + $0x4c] ss:$16 sps:$4 sm:$0xff]   ;;  %v1248_v22 = vld [vmem:[%s1599_s2 + $0x40] ss:$16 sps:$4 sm:$0xff]   ;;  %v1255_v23 = vld [vmem:[%s1599_s2 + $0x48] ss:$16 sps:$4 sm:$0xff]  }
  0x13   : > { %v1260_v24 = vld [vmem:[%s1599_s2 + $0x24] ss:$16 sps:$4 sm:$0xff]   ;;  %v1267_v25 = vld [vmem:[%s1599_s2 + $0x2c] ss:$16 sps:$4 sm:$0xff]   ;;  %v1272_v26 = vld [vmem:[%s1599_s2 + $0x20] ss:$16 sps:$4 sm:$0xff]  }
  0x14   : > { %v1277_v27 = vld [vmem:[%s1599_s2 + $0x28] ss:$16 sps:$4 sm:$0xff]   ;;  %v1284_v28 = vld [vmem:[%s1599_s2 + $0x4] ss:$16 sps:$4 sm:$0xff]   ;;  %v1291_v29 = vld [vmem:[%s1599_s2 + $0xc] ss:$16 sps:$4 sm:$0xff]  }
  0x15   : > { %582 = vmatpush1.bf16.msra.mxu0 %v1176_v10  ;;  %623 = vmatpush1.bf16.msra.mxu1 %v1181_v11  ;;  %v1296_v30 = vld [vmem:[%s1599_s2] ss:$16 sps:$4 sm:$0xff]   ;;  %v1303_v31 = vld [vmem:[%s1599_s2 + $0x8] ss:$16 sps:$4 sm:$0xff]   ;;  %v1308_v32 = vld [vmem:[%s1599_s2 + $0x1e4] ss:$16 sps:$4 sm:$0xff]  }
  0x16   : > { %583 = vmatprep.subr.bf16.mxu0 %v1188_v12  ;;  %624 = vmatprep.subr.bf16.mxu1 %v1195_v13  ;;  %v1315_v33 = vld [vmem:[%s1599_s2 + $0x1ec] ss:$16 sps:$4 sm:$0xff]   ;;  %p175_p3 = scmp.lt.s32.totalorder %s889_s13, 1  ;;  %v1322_v34 = vld [vmem:[%s1599_s2 + $0x1e0] ss:$16 sps:$4 sm:$0xff]  }
  0x17   : > { %v1327_v35 = vld [vmem:[%s1599_s2 + $0x1e8] ss:$16 sps:$4 sm:$0xff]   ;;  %v1334_v36 = vld [vmem:[%s1599_s2 + $0x1c4] ss:$16 sps:$4 sm:$0xff]   ;;  %v1341_v37 = vld [vmem:[%s1599_s2 + $0x1cc] ss:$16 sps:$4 sm:$0xff]  }
  0x18   : > { %s1614_s13 = smov (!%p175_p3, %s889_s13), 1  ;;  %v1350_v38 = vld [vmem:[%s1599_s2 + $0x1c0] ss:$16 sps:$4 sm:$0xff]   ;;  %v1357_v39 = vld [vmem:[%s1599_s2 + $0x1c8] ss:$16 sps:$4 sm:$0xff]  }
  0x19   : > { %584 = vmatpush1.bf16.msra.mxu0 %v1200_v14  ;;  %625 = vmatpush1.bf16.msra.mxu1 %v1207_v15  ;;  %v1362_v40 = vld [vmem:[%s1599_s2 + $0x1a4] ss:$16 sps:$4 sm:$0xff]   ;;  %v1369_v41 = vld [vmem:[%s1599_s2 + $0x1ac] ss:$16 sps:$4 sm:$0xff]   ;;  %s965_s23 = sshll.u32 %s1614_s13, 4 }
  0x1a   : > { %585 = vmatprep.subr.bf16.mxu0 %v1212_v16  ;;  %626 = vmatprep.subr.bf16.mxu1 %v1219_v17  ;;  %v1375_v42 = vld [vmem:[%s1599_s2 + $0x1a0] ss:$16 sps:$4 sm:$0xff]   ;;  %v1380_v43 = vld [vmem:[%s1599_s2 + $0x1a8] ss:$16 sps:$4 sm:$0xff]   ;;  %v1387_v44 = vld [vmem:[%s1599_s2 + $0x184] ss:$16 sps:$4 sm:$0xff]   ;;  %s1394_s5 = scalar_lea.vmem %s1597_s0, %s965_s23  ;;  %s1517_s26 = scalar_lea.vmem %s1598_s1, %s965_s23 }
  0x1b   : > { %v1401_v45 = vld [vmem:[%s1599_s2 + $0x18c] ss:$16 sps:$4 sm:$0xff]   ;;  %v1409_v47 = vld [vmem:[%s1599_s2 + $0x180] ss:$16 sps:$4 sm:$0xff]   ;;  %v1414_v48 = vld [vmem:[%s1599_s2 + $0x188] ss:$16 sps:$4 sm:$0xff]  }
  0x1c   : > { %v254_v46 = vld [vmem:[%s1394_s5 + $0x8] sm:$0xff]  ;;  %v1421_v50 = vld [vmem:[%s1599_s2 + $0x164] ss:$16 sps:$4 sm:$0xff]   ;;  %v1433_v52 = vld [vmem:[%s1599_s2 + $0x160] ss:$16 sps:$4 sm:$0xff]   ;;  %s898_s23 = sshll.u32 %s1614_s13, 1 }
  0x1d   : > { %586 = vmatpush1.bf16.msra.mxu0 %v1224_v18  ;;  %627 = vmatpush1.bf16.msra.mxu1 %v1229_v19  ;;  %v256_v49 = vpack.c.bf16 %v254_v46, %v254_v46  ;;  %v1426_v51 = vld [vmem:[%s1599_s2 + $0x16c] ss:$16 sps:$4 sm:$0xff]   ;;  %v1438_v53 = vld [vmem:[%s1599_s2 + $0x168] ss:$16 sps:$4 sm:$0xff]   ;;  %v1445_v54 = vld [vmem:[%s1599_s2 + $0x144] ss:$16 sps:$4 sm:$0xff]   ;;  %s188_s28 = scalar_lea.vmem %s1600_s3, %s898_s23 }
  0x1e   : > { %587 = vmatprep.subr.bf16.mxu0 %v1236_v20  ;;  %628 = vmatprep.subr.bf16.mxu1 %v1243_v21  ;;  %v1450_v55 = vld [vmem:[%s1599_s2 + $0x14c] ss:$16 sps:$4 sm:$0xff]   ;;  %v1457_v56 = vld [vmem:[%s1599_s2 + $0x140] ss:$16 sps:$4 sm:$0xff]   ;;  %v1462_v57 = vld [vmem:[%s1599_s2 + $0x148] ss:$16 sps:$4 sm:$0xff]  }
  0x1f   : > { %609 = vmatprep.mubr.bf16.mxu0 %v256_v49  ;;  %650 = vmatprep.mubr.bf16.mxu1 %v256_v49  ;;  %v1469_v58 = vld [vmem:[%s1599_s2 + $0x124] ss:$16 sps:$4 sm:$0xff]   ;;  %v1474_v59 = vld [vmem:[%s1599_s2 + $0x12c] ss:$16 sps:$4 sm:$0xff]   ;;  %v1481_v60 = vld [vmem:[%s1599_s2 + $0x120] ss:$16 sps:$4 sm:$0xff]  }
  0x20   : > { %1605 = vst [vmem:[#allocation2_spill] sm:$0xff] %v1469_v58  ;;  %1606 = vst [vmem:[#allocation3_spill] sm:$0xff] %v1474_v59  ;;  %v1486_v61 = vld [vmem:[%s1599_s2 + $0x128] ss:$16 sps:$4 sm:$0xff]   ;;  %v1493_v62 = vld [vmem:[%s1599_s2 + $0x104] ss:$16 sps:$4 sm:$0xff]  }
  0x21   : > { %588 = vmatpush1.bf16.msra.mxu0 %v1248_v22  ;;  %629 = vmatpush1.bf16.msra.mxu1 %v1255_v23  ;;  %1607 = vst [vmem:[#allocation4_spill] sm:$0xff] %v1481_v60  ;;  %1608 = vst [vmem:[#allocation5_spill] sm:$0xff] %v1486_v61  ;;  %v1498_v63 = vld [vmem:[%s1599_s2 + $0x10c] ss:$16 sps:$4 sm:$0xff]   ;;  %v1505_v46 = vld [vmem:[%s1599_s2 + $0x100] ss:$16 sps:$4 sm:$0xff]  }
  0x22   : > { %589 = vmatprep.subr.bf16.mxu0 %v1260_v24  ;;  %630 = vmatprep.subr.bf16.mxu1 %v1267_v25  ;;  %v1510_v49 = vld [vmem:[%s1599_s2 + $0x108] ss:$16 sps:$4 sm:$0xff]  }
  0x25   : > { %590 = vmatpush1.bf16.msra.mxu0 %v1272_v26  ;;  %631 = vmatpush1.bf16.msra.mxu1 %v1277_v27 }
  0x26   : > { %591 = vmatprep.subr.bf16.mxu0 %v1284_v28  ;;  %632 = vmatprep.subr.bf16.mxu1 %v1291_v29 }
  0x29   : > { %592 = vmatpush1.bf16.msra.mxu0 %v1296_v30  ;;  %633 = vmatpush1.bf16.msra.mxu1 %v1303_v31 }
  0x2a   : > { %593 = vmatprep.subr.bf16.mxu0 %v1308_v32  ;;  %634 = vmatprep.subr.bf16.mxu1 %v1315_v33 }
  0x2d   : > { %594 = vmatpush2.bf16.msra.mxu0 %v1322_v34  ;;  %635 = vmatpush2.bf16.msra.mxu1 %v1327_v35 }
  0x2e   : > { %595 = vmatprep.subr.bf16.mxu0 %v1334_v36  ;;  %636 = vmatprep.subr.bf16.mxu1 %v1341_v37 }
  0x31   : > { %596 = vmatpush2.bf16.msra.mxu0 %v1350_v38  ;;  %637 = vmatpush2.bf16.msra.mxu1 %v1357_v39 }
  0x32   : > { %597 = vmatprep.subr.bf16.mxu0 %v1362_v40  ;;  %638 = vmatprep.subr.bf16.mxu1 %v1369_v41 }
  0x35   : > { %598 = vmatpush2.bf16.msra.mxu0 %v1375_v42  ;;  %639 = vmatpush2.bf16.msra.mxu1 %v1380_v43 }
  0x36   : > { %599 = vmatprep.subr.bf16.mxu0 %v1387_v44  ;;  %640 = vmatprep.subr.bf16.mxu1 %v1401_v45 }
  0x39   : > { %600 = vmatpush2.bf16.msra.mxu0 %v1409_v47  ;;  %641 = vmatpush2.bf16.msra.mxu1 %v1414_v48 }
  0x3a   : > { %601 = vmatprep.subr.bf16.mxu0 %v1421_v50  ;;  %642 = vmatprep.subr.bf16.mxu1 %v1426_v51 }
  0x3d   : > { %602 = vmatpush2.bf16.msra.mxu0 %v1433_v52  ;;  %643 = vmatpush2.bf16.msra.mxu1 %v1438_v53 }
  0x3e   : > { %603 = vmatprep.subr.bf16.mxu0 %v1445_v54  ;;  %644 = vmatprep.subr.bf16.mxu1 %v1450_v55 }
  0x41   : > { %604 = vmatpush2.bf16.msra.mxu0 %v1457_v56  ;;  %645 = vmatpush2.bf16.msra.mxu1 %v1462_v57 }
  0x42   : > { %605 = vmatprep.subr.bf16.mxu0 %v1469_v58  ;;  %646 = vmatprep.subr.bf16.mxu1 %v1474_v59  ;;  %v660_v59 = vld [vmem:[%s1517_s26 + $0x8] sm:$0xff] }
  0x43   : > { %v662_v58 = vpack.c.bf16 %v660_v59, %v660_v59 }
  0x45   : > { %606 = vmatpush2.bf16.msra.mxu0 %v1481_v60  ;;  %647 = vmatpush2.bf16.msra.mxu1 %v1486_v61  ;;  %v253_v60 = vld [vmem:[%s1394_s5] sm:$0xff] }
  0x46   : > { %607 = vmatprep.subr.bf16.mxu0 %v1493_v62  ;;  %648 = vmatprep.subr.bf16.mxu1 %v1498_v63  ;;  %v255_v61 = vpack.c.bf16 %v253_v60, %v253_v60 }
  0x49   : > { %608 = vmatpush2.bf16.msra.mxu0 %v1505_v46  ;;  %649 = vmatpush2.bf16.msra.mxu1 %v1510_v49 }
  0x4a   : > { %663 = vmatprep.subr.bf16.mxu0 %v1120_v0  ;;  %704 = vmatprep.subr.bf16.mxu1 %v1125_v1  ;;  %v1609_v0 = vld [vmem:[#allocation2_spill] sm:$0xff]  ;;  %v1610_v1 = vld [vmem:[#allocation3_spill] sm:$0xff] }
  0x4c   : > { %610 = vmatmul.mubr.bf16.vlgmr.msra.gmra.mxu0 %v255_v61  ;;  %651 = vmatmul.mubr.bf16.vlgmr.msra.gmra.mxu1 %v255_v61 }
  0x4d   : > { %664 = vmatpush1.bf16.msra.mxu0 %v1131_v2  ;;  %705 = vmatpush1.bf16.msra.mxu1 %v1136_v3  ;;  %v659_v2 = vld [vmem:[%s1517_s26] sm:$0xff]  ;;  %v1611_v3 = vld [vmem:[#allocation4_spill] sm:$0xff] }
  0x4e   : > { %665 = vmatprep.subr.bf16.mxu0 %v1142_v4  ;;  %706 = vmatprep.subr.bf16.mxu1 %v1149_v5  ;;  %v1612_v4 = vld [vmem:[#allocation5_spill] sm:$0xff]  ;;  %v661_v5 = vpack.c.bf16 %v659_v2, %v659_v2 }
  0x4f   : > { %695 = vmatprep.mubr.bf16.mxu0 %v662_v58  ;;  %736 = vmatprep.mubr.bf16.mxu1 %v662_v58 }
  0x51   : > { %666 = vmatpush1.bf16.msra.mxu0 %v1154_v6  ;;  %707 = vmatpush1.bf16.msra.mxu1 %v1160_v7 }
  0x52   : > { %667 = vmatprep.subr.bf16.mxu0 %v1166_v8  ;;  %708 = vmatprep.subr.bf16.mxu1 %v1171_v9 }
  0x55   : > { %668 = vmatpush1.bf16.msra.mxu0 %v1176_v10  ;;  %709 = vmatpush1.bf16.msra.mxu1 %v1181_v11 }
  0x56   : > { %669 = vmatprep.subr.bf16.mxu0 %v1188_v12  ;;  %710 = vmatprep.subr.bf16.mxu1 %v1195_v13 }
  0x59   : > { %670 = vmatpush1.bf16.msra.mxu0 %v1200_v14  ;;  %711 = vmatpush1.bf16.msra.mxu1 %v1207_v15 }
  0x5a   : > { %671 = vmatprep.subr.bf16.mxu0 %v1212_v16  ;;  %712 = vmatprep.subr.bf16.mxu1 %v1219_v17 }
  0x5d   : > { %672 = vmatpush1.bf16.msra.mxu0 %v1224_v18  ;;  %713 = vmatpush1.bf16.msra.mxu1 %v1229_v19 }
  0x5e   : > { %673 = vmatprep.subr.bf16.mxu0 %v1236_v20  ;;  %714 = vmatprep.subr.bf16.mxu1 %v1243_v21 }
  0x61   : > { %674 = vmatpush1.bf16.msra.mxu0 %v1248_v22  ;;  %715 = vmatpush1.bf16.msra.mxu1 %v1255_v23 }
  0x62   : > { %675 = vmatprep.subr.bf16.mxu0 %v1260_v24  ;;  %716 = vmatprep.subr.bf16.mxu1 %v1267_v25 }
  0x65   : > { %676 = vmatpush1.bf16.msra.mxu0 %v1272_v26  ;;  %717 = vmatpush1.bf16.msra.mxu1 %v1277_v27 }
  0x66   : > { %677 = vmatprep.subr.bf16.mxu0 %v1284_v28  ;;  %718 = vmatprep.subr.bf16.mxu1 %v1291_v29 }
  0x69   : > { %678 = vmatpush1.bf16.msra.mxu0 %v1296_v30  ;;  %719 = vmatpush1.bf16.msra.mxu1 %v1303_v31 }
  0x6a   : > { %679 = vmatprep.subr.bf16.mxu0 %v1308_v32  ;;  %720 = vmatprep.subr.bf16.mxu1 %v1315_v33 }
  0x6d   : > { %680 = vmatpush2.bf16.msra.mxu0 %v1322_v34  ;;  %721 = vmatpush2.bf16.msra.mxu1 %v1327_v35 }
  0x6e   : > { %681 = vmatprep.subr.bf16.mxu0 %v1334_v36  ;;  %722 = vmatprep.subr.bf16.mxu1 %v1341_v37 }
  0x71   : > { %682 = vmatpush2.bf16.msra.mxu0 %v1350_v38  ;;  %723 = vmatpush2.bf16.msra.mxu1 %v1357_v39 }
  0x72   : > { %683 = vmatprep.subr.bf16.mxu0 %v1362_v40  ;;  %724 = vmatprep.subr.bf16.mxu1 %v1369_v41 }
  0x75   : > { %684 = vmatpush2.bf16.msra.mxu0 %v1375_v42  ;;  %725 = vmatpush2.bf16.msra.mxu1 %v1380_v43 }
  0x76   : > { %685 = vmatprep.subr.bf16.mxu0 %v1387_v44  ;;  %726 = vmatprep.subr.bf16.mxu1 %v1401_v45 }
  0x79   : > { %686 = vmatpush2.bf16.msra.mxu0 %v1409_v47  ;;  %727 = vmatpush2.bf16.msra.mxu1 %v1414_v48 }
  0x7a   : > { %687 = vmatprep.subr.bf16.mxu0 %v1421_v50  ;;  %728 = vmatprep.subr.bf16.mxu1 %v1426_v51 }
  0x7d   : > { %688 = vmatpush2.bf16.msra.mxu0 %v1433_v52  ;;  %729 = vmatpush2.bf16.msra.mxu1 %v1438_v53 }
  0x7e   : > { %689 = vmatprep.subr.bf16.mxu0 %v1445_v54  ;;  %730 = vmatprep.subr.bf16.mxu1 %v1450_v55 }
  0x81   : > { %690 = vmatpush2.bf16.msra.mxu0 %v1457_v56  ;;  %731 = vmatpush2.bf16.msra.mxu1 %v1462_v57 }
  0x82   : > { %691 = vmatprep.subr.bf16.mxu0 %v1609_v0  ;;  %732 = vmatprep.subr.bf16.mxu1 %v1610_v1  ;;  %v807_v1 = vlaneseq }
  0x84   : > { %vm821_vm8 = vcmp.lt.s32.totalorder %v807_v1, 256 }
  0x85   : > { %692 = vmatpush2.bf16.msra.mxu0 %v1611_v3  ;;  %733 = vmatpush2.bf16.msra.mxu1 %v1612_v4 }
  0x86   : > { %693 = vmatprep.subr.bf16.mxu0 %v1493_v62  ;;  %734 = vmatprep.subr.bf16.mxu1 %v1498_v63 }
  0x89   : > { %694 = vmatpush2.bf16.msra.mxu0 %v1505_v46  ;;  %735 = vmatpush2.bf16.msra.mxu1 %v1510_v49  ;;  %v1088_v49 = vmov 1966171168  }
  0x8a   : > { %v805_v0 = vunpack.c.l.s4 %v1088_v49 }
  0x8c   : > { %696 = vmatmul.mubr.bf16.vlgmr.msra.gmra.mxu0 %v661_v5  ;;  %737 = vmatmul.mubr.bf16.vlgmr.msra.gmra.mxu1 %v661_v5 }
 0x10c   : > { %v611_v6 = vpop.f32.mrf.mxu0  ;;  %v652_v7 = vpop.f32.mrf.mxu1 }
 0x10d   : > { %v745_v8 = vmul.f32 %v611_v6, %v611_v6  ;;  %v747_v9 = vmul.f32 %v652_v7, %v652_v7  ;;  %v806_v6 = vunpack.c.0.s8 %v805_v0  ;;  %v808_v7 = vshrl.u32 %v807_v1, 7 }
 0x10e   : > { %v613_v10 = vpop.f32.mrf.mxu0  ;;  %v654_v11 = vpop.f32.mrf.mxu1 }
 0x10f   : > { %v749_v12 = vadd.f32 %v747_v9, %v745_v8  ;;  %v746_v13 = vmul.f32 %v613_v10, %v613_v10  ;;  %v748_v14 = vmul.f32 %v654_v11, %v654_v11  ;;  %v809_v11 = vsub.s32 %v806_v6, %v808_v7 }
 0x110   : > { %v615_v15 = vpop.f32.mrf.mxu0  ;;  %v656_v16 = vpop.f32.mrf.mxu1 }
 0x111   : > { %v750_v17 = vadd.f32 %v748_v14, %v746_v13  ;;  %1072 = vrsqrt.f32 %v749_v12  ;;  %vm753_vm0 = vcmp.eq.f32.partialorder %v749_v12, inf  ;;  %v756_v41 = vand.u32 2147483648, %v749_v12 }
 0x112   : > { %v616_v18 = vpop.f32.mrf.mxu0  ;;  %v657_v19 = vpop.f32.mrf.mxu1  ;;  %vm755_vm2 = vcmp.eq.f32.partialorder %v749_v12, 0.0 }
 0x113   : > { %1074 = vrsqrt.f32 %v750_v17  ;;  %vm760_vm3 = vcmp.eq.f32.partialorder %v750_v17, inf  ;;  %v763_v51 = vand.u32 2147483648, %v750_v17  ;;  %vm762_vm6 = vcmp.eq.f32.partialorder %v750_v17, 0.0 }
 0x11e   : > { %v1073_v34 = vpop.eup %1072 }
 0x11f   : > { %v752_v36 = vmul.f32 %v1073_v34, %v749_v12 }
 0x120   : > { %v1075_v35 = vpop.eup %1074 }
 0x121   : > { %v759_v38 = vmul.f32 %v1075_v35, %v750_v17  ;;  %v754_v39 = vsel %vm753_vm0, %v749_v12, %v752_v36 }
 0x122   : > { %v757_v45 = vsel %vm755_vm2, %v756_v41, %v754_v39 }
 0x123   : > { %v761_v47 = vsel %vm760_vm3, %v750_v17, %v759_v38 }
 0x124   : > { %v764_v55 = vsel %vm762_vm6, %v763_v51, %v761_v47 }
 0x14c   : > { %v697_v20 = vpop.f32.mrf.mxu0  ;;  %v738_v21 = vpop.f32.mrf.mxu1 }
 0x14d   : > { %v765_v22 = vmul.f32 %v697_v20, %v697_v20  ;;  %v767_v23 = vmul.f32 %v738_v21, %v738_v21 }
 0x14e   : > { %v699_v24 = vpop.f32.mrf.mxu0  ;;  %v740_v25 = vpop.f32.mrf.mxu1 }
 0x14f   : > { %v769_v26 = vadd.f32 %v767_v23, %v765_v22  ;;  %v766_v27 = vmul.f32 %v699_v24, %v699_v24  ;;  %v768_v28 = vmul.f32 %v740_v25, %v740_v25 }
 0x150   : > { %v701_v29 = vpop.f32.mrf.mxu0  ;;  %v742_v30 = vpop.f32.mrf.mxu1 }
 0x151   : > { %1076 = vrsqrt.f32 %v769_v26  ;;  %v770_v31 = vadd.f32 %v768_v28, %v766_v27  ;;  %vm773_vm1 = vcmp.eq.f32.partialorder %v769_v26, inf  ;;  %v776_v42 = vand.u32 2147483648, %v769_v26 }
 0x152   : > { %v702_v32 = vpop.f32.mrf.mxu0  ;;  %v743_v33 = vpop.f32.mrf.mxu1  ;;  %vm775_vm4 = vcmp.eq.f32.partialorder %v769_v26, 0.0 }
 0x153   : > { %1078 = vrsqrt.f32 %v770_v31  ;;  %vm780_vm5 = vcmp.eq.f32.partialorder %v770_v31, inf  ;;  %v783_v53 = vand.u32 2147483648, %v770_v31  ;;  %vm782_vm7 = vcmp.eq.f32.partialorder %v770_v31, 0.0 }
 0x15e   : > { %v1077_v37 = vpop.eup %1076 }
 0x15f   : > { %v772_v40 = vmul.f32 %v1077_v37, %v769_v26 }
 0x160   : > { %v1079_v43 = vpop.eup %1078 }
 0x161   : > { %v774_v44 = vsel %vm773_vm1, %v769_v26, %v772_v40  ;;  %v779_v50 = vmul.f32 %v1079_v43, %v770_v31 }
 0x162   : > { %v777_v48 = vsel %vm775_vm4, %v776_v42, %v774_v44 }
 0x163   : > { %v785_v52 = vsub.f32 %v757_v45, %v777_v48  ;;  %v781_v54 = vsel %vm780_vm5, %v770_v31, %v779_v50 }
 0x164   : > { %v784_v57 = vsel %vm782_vm7, %v783_v53, %v781_v54 }
 0x165   : > { %v787_v56 = vand.u32 2147483647, %v785_v52  ;;  %v786_v58 = vsub.f32 %v764_v55, %v784_v57 }
 0x167   : > { %v789_v59 = vrot.slane %v787_v56, 4  ;;  %v788_v60 = vand.u32 2147483647, %v786_v58 }
 0x169   : > { %v790_v61 = vadd.f32 %v789_v59, %v787_v56  ;;  %v795_v62 = vrot.slane %v788_v60, 4 }
 0x16b   : > { %v791_v63 = vrot.slane %v790_v61, 2  ;;  %v796_v46 = vadd.f32 %v795_v62, %v788_v60 }
 0x16d   : > { %v792_v2 = vadd.f32 %v791_v63, %v790_v61  ;;  %v797_v3 = vrot.slane %v796_v46, 2 }
 0x16f   : > { %v793_v4 = vrot.slane %v792_v2, 1  ;;  %v798_v5 = vadd.f32 %v797_v3, %v796_v46 }
 0x171   : > { %v799_v8 = vrot.slane %v798_v5, 1  ;;  %v794_v9 = vadd.f32 %v793_v4, %v792_v2 }
 0x173   : > { %v800_v10 = vadd.f32 %v799_v8, %v798_v5 }
 0x175   : > { %v803_v12 = vcombine.low %v794_v9, %v800_v10 }
 0x177   : > { %v810_v13 = vrot.slane %v803_v12, %v809_v11 }
 0x179   : > { %v817_v14 = vrot.slane %v810_v13, %v809_v11 }
 0x17b   : > { %823 = vst.msk [vmem:[%s188_s28] sm:$0x3] %vm821_vm8, %v817_v14 }
 0x17c PF: > { %s13_s12 = sadd.s32 1, %s1086_s12  }
 0x17d   : > { %p10_p4 = scmp.ge.s32.totalorder %s13_s12, 4  }
 0x17f   :  { %12 = sbr.rel (!%p10_p4) target bundleno = 1 (0x1), region = 65 }

</bundles_post_ra>
